<compile_context>
chip_gen: v7x
topology: tpu7x:2x2x1
jax: 0.10.0
libtpu: 0.0.40
codegen_flags: <defaults>
</compile_context>

<pallas_src>
import math

import jax
import jax.numpy as jnp
from jax.experimental import pallas as pl
from jax.experimental.pallas import tpu as pltpu


# ----------------------------------------------------------------------- kernel
def _two_layer_kernel(x_ref, w1_ref, b1_ref, w2_ref, b2_ref, y_ref, h_ref, acc_ref):
    j = pl.program_id(1)  # hidden-dim tile index (reduction axis for y)

    @pl.when(j == 0)
    def _():
        acc_ref[...] = jnp.zeros_like(acc_ref)

    # hidden slice: x @ W1t[:, jt] + b1[jt]   (W1t pre-transposed -> MXU-direct)
    h_in = (
        jnp.dot(x_ref[...], w1_ref[...], preferred_element_type=jnp.float32)
        + b1_ref[...]
    )
    # sigmoid via a single EUP tanh: sigmoid(x) = 0.5 * (tanh(x/2) + 1)
    h = 0.5 * (jnp.tanh(0.5 * h_in) + 1.0)
    h_ref[...] = h.astype(h_ref.dtype)

    # partial output: h[:, jt] @ W2t[jt, :], accumulated in f32
    acc_ref[...] += jnp.dot(
        h.astype(w2_ref.dtype), w2_ref[...], preferred_element_type=jnp.float32
    )

    @pl.when(j == pl.num_programs(1) - 1)
    def _():
        y_ref[...] = (acc_ref[...] + b2_ref[...]).astype(y_ref.dtype)


# ----------------------------------------------------------------------- planning
def _round_up(x, m):
    return ((x + m - 1) // m) * m


def _vmem_capacity_bytes():
    try:
        return int(pltpu.get_tpu_info().vmem_capacity_bytes)
    except Exception:
        return 64 * 1024 * 1024  # conservative: v7x per-TensorCore VMEM


def _plan(batch, n_in_p, n_hid_p, n_out_p, itemsize, h_itemsize):
    """Pick (tile_b, tile_h, padded_batch, vmem_limit_bytes) for this TPU generation."""
    vmem = _vmem_capacity_bytes()
    big_vmem = vmem >= 96 * 1024 * 1024                  # v5e / v6e: 128 MiB parts
    vmem_cap = (100 if big_vmem else 48) * 1024 * 1024   # ceiling we will request
    act_budget = (12 if big_vmem else 5) * 1024 * 1024   # per-step activation budget
    wgt_budget = vmem_cap // 2

    # ---- hidden-dim tiling: only when resident weights would not fit VMEM ----
    full_wgt = (n_in_p * n_hid_p + n_hid_p * n_out_p) * itemsize
    if full_wgt <= wgt_budget:
        tile_h = n_hid_p                                  # fully resident, single-buffered
        wgt_bytes = full_wgt + (n_hid_p + n_out_p) * 4
    else:
        per_h = 2 * (n_in_p + n_out_p) * itemsize         # dbl-buffered W1t col + W2t row
        tile_h = max(128, (wgt_budget // per_h) // 128 * 128)
        tile_h = min(tile_h, n_hid_p)
        while n_hid_p % tile_h:                           # keep an even 128-multiple split
            tile_h -= 128
        wgt_bytes = per_h * tile_h + 2 * (tile_h + n_out_p) * 4

    # ---- batch tiling ----
    per_row = (
        2 * (n_in_p * itemsize + tile_h * h_itemsize + n_out_p * 4)  # dbl-buf x/h/y
        + n_out_p * 4                                                # f32 accumulator
    )
    max_rows = max(8, act_budget // per_row)
    sub = 8 * max(1, 4 // itemsize)                       # sublane pack: 8 f32 / 16 bf16
    if batch <= 128:
        tile_b = _round_up(batch, sub)                    # tiny batch: one tile, no waste
    else:
        align = 256 if max_rows >= 256 else 128           # MXU-M aligned tiles
        tile_b = max(align, min(1024, max_rows) // align * align)
        # keep at least two batch tiles so both v7x TensorCores get work
        half = _round_up(pl.cdiv(batch, 2), 128)
        tile_b = min(tile_b, max(128, half))
    padded_batch = _round_up(batch, tile_b)

    needed = per_row * tile_b + wgt_bytes + (2 << 20)     # +2 MiB headroom
    vmem_limit = int(min(max(needed, 16 * 1024 * 1024), vmem_cap))
    return tile_b, tile_h, padded_batch, vmem_limit


def _weight_spec(shape, index_map, single_buffer):
    if single_buffer:
        try:
            # constant index_map -> double-buffering buys nothing; halve residency
            return pl.BlockSpec(shape, index_map, pipeline_mode=pl.Buffered(1))
        except Exception:  # toolchain without pipeline_mode / Buffered support
            pass
    return pl.BlockSpec(shape, index_map)


# ----------------------------------------------------------------------- wrapper
def two_layer_net_forward(x, w1, b1, w2, b2, *, compute_dtype=jnp.bfloat16):
    """Forward of TwoLayerNet. Returns (y_pred [f32], h_output [compute_dtype]).

    x:  (batch, n_input)
    w1: (n_hidden, n_input), b1: (n_hidden,)   -- PyTorch nn.Linear layout
    w2: (n_output, n_hidden), b2: (n_output,)
    """
    batch, n_input = x.shape
    n_hidden = w1.shape[0]
    n_output = w2.shape[0]

    itemsize = jnp.dtype(compute_dtype).itemsize
    h_dtype = compute_dtype  # bf16 h halves the dominant writeback stream
    h_itemsize = jnp.dtype(h_dtype).itemsize

    # Lane-dense padding: feature dims -> multiples of 128 (unmasked stores, full MXU N).
    n_in_p = _round_up(n_input, 128)
    n_hid_p = _round_up(n_hidden, 128)
    n_out_p = _round_up(n_output, 128)

    tile_b, tile_h, padded_batch, vmem_limit = _plan(
        batch, n_in_p, n_hid_p, n_out_p, itemsize, h_itemsize
    )
    grid = (padded_batch // tile_b, n_hid_p // tile_h)
    resident = grid[1] == 1  # weights fully VMEM-resident?

    # One-time host-side transpose + zero-pad (kernel computes x @ W1t / h @ W2t).
    w1t = (
        jnp.zeros((n_in_p, n_hid_p), compute_dtype)
        .at[:n_input, :n_hidden].set(w1.T.astype(compute_dtype))
    )
    w2t = (
        jnp.zeros((n_hid_p, n_out_p), compute_dtype)
        .at[:n_hidden, :n_output].set(w2.T.astype(compute_dtype))
    )
    b1p = jnp.zeros((1, n_hid_p), jnp.float32).at[0, :n_hidden].set(b1.astype(jnp.float32))
    b2p = jnp.zeros((1, n_out_p), jnp.float32).at[0, :n_output].set(b2.astype(jnp.float32))
    xp = (
        jnp.zeros((padded_batch, n_in_p), compute_dtype)
        .at[:batch, :n_input].set(x.astype(compute_dtype))
    )

    cost = pl.CostEstimate(
        flops=2 * padded_batch * (n_in_p * n_hid_p + n_hid_p * n_out_p),
        transcendentals=padded_batch * n_hid_p,
        bytes_accessed=(
            xp.size * itemsize + w1t.size * itemsize + w2t.size * itemsize
            + (b1p.size + b2p.size) * 4
            + padded_batch * n_out_p * 4 + padded_batch * n_hid_p * h_itemsize
        ),
    )

    def _build(single_buffer):
        in_specs = [
            pl.BlockSpec((tile_b, n_in_p), lambda i, j: (i, 0)),               # x
            _weight_spec((n_in_p, tile_h), lambda i, j: (0, j),
                         resident and single_buffer),                          # W1t
            _weight_spec((1, tile_h), lambda i, j: (0, j),
                         resident and single_buffer),                          # b1
            _weight_spec((tile_h, n_out_p), lambda i, j: (j, 0),
                         resident and single_buffer),                          # W2t
            _weight_spec((1, n_out_p), lambda i, j: (0, 0), single_buffer),    # b2
        ]
        out_specs = (
            pl.BlockSpec((tile_b, n_out_p), lambda i, j: (i, 0)),              # y_pred
            pl.BlockSpec((tile_b, tile_h), lambda i, j: (i, j)),               # h_output
        )
        return pl.pallas_call(
            _two_layer_kernel,
            out_shape=(
                jax.ShapeDtypeStruct((padded_batch, n_out_p), jnp.float32),
                jax.ShapeDtypeStruct((padded_batch, n_hid_p), h_dtype),
            ),
            grid=grid,
            in_specs=in_specs,
            out_specs=out_specs,
            scratch_shapes=[pltpu.VMEM((tile_b, n_out_p), jnp.float32)],
            compiler_params=pltpu.CompilerParams(
                dimension_semantics=("parallel", "arbitrary"),
                vmem_limit_bytes=vmem_limit,
            ),
            cost_estimate=cost,
        )

    try:
        y_pad, h_pad = _build(True)(xp, w1t, b1p, w2t, b2p)
    except Exception:
        # Fallback for toolchains that reject single-buffered (Buffered(1)) specs.
        y_pad, h_pad = _build(False)(xp, w1t, b1p, w2t, b2p)

    return y_pad[:batch, :n_output], h_pad[:batch, :n_hidden]


# ----------------------------------------------------------------------- test
def _init_linear_params(key, out_features, in_features):
    # Mimics PyTorch nn.Linear default init: U(-1/sqrt(fan_in), 1/sqrt(fan_in)).
    k_w, k_b = jax.random.split(key)
    bound = 1.0 / math.sqrt(in_features)
    w = jax.random.uniform(
        k_w, (out_features, in_features), jnp.float32, minval=-bound, maxval=bound
    )
    b = jax.random.uniform(
        k_b, (out_features,), jnp.float32, minval=-bound, maxval=bound
    )
    return w, b


if __name__ == "__main__":
    n_input, n_hidden, n_output = 32, 32, 8
    batch = 8

    key = jax.random.PRNGKey(0)
    k_x, k_l1, k_l2 = jax.random.split(key, 3)

    x = jax.random.normal(k_x, (batch, n_input), dtype=jnp.float32)
    w1, b1 = _init_linear_params(k_l1, n_hidden, n_input)
    w2, b2 = _init_linear_params(k_l2, n_output, n_hidden)

    # Plain-JAX reference (same math as the torch forward).
    h_ref = jax.nn.sigmoid(x @ w1.T + b1)
    y_ref = h_ref @ w2.T + b2

    # f32 path: tight correctness check.
    y_pred, h_output = two_layer_net_forward(x, w1, b1, w2, b2, compute_dtype=jnp.float32)
    jax.block_until_ready((y_pred, h_output))
    assert jnp.allclose(h_output, h_ref, atol=1e-5, rtol=1e-5)
    assert jnp.allclose(y_pred, y_ref, atol=1e-5, rtol=1e-5)

    # bf16 default (production) path: loose sanity check.
    y_bf, h_bf = two_layer_net_forward(x, w1, b1, w2, b2)
    jax.block_until_ready((y_bf, h_bf))
    assert jnp.allclose(y_bf, y_ref, atol=1e-1, rtol=1e-1)

    print("KERNEL_OK")
</pallas_src>

<mosaic_0001>
module attributes {stable_mosaic.version = 11 : i64} {
  func.func @_two_layer_kernel(%arg0: i32, %arg1: i32, %arg2: memref<8x128xf32, #tpu.memory_space<vmem>>, %arg3: memref<128x128xf32, #tpu.memory_space<vmem>>, %arg4: memref<1x128xf32, #tpu.memory_space<vmem>>, %arg5: memref<128x128xf32, #tpu.memory_space<vmem>>, %arg6: memref<1x128xf32, #tpu.memory_space<vmem>>, %arg7: memref<8x128xf32, #tpu.memory_space<vmem>>, %arg8: memref<8x128xf32, #tpu.memory_space<vmem>>, %arg9: memref<8x128xf32, #tpu.memory_space<vmem>>) attributes {dimension_semantics = [#tpu.dimension_semantics<parallel>, #tpu.dimension_semantics<arbitrary>], iteration_bounds = array<i64: 1, 1>, scalar_prefetch = 0 : i64, scratch_operands = 1 : i64, tpu.core_type = #tpu.core_type<tc>, window_params = [{transform_indices = @transform_0, window_bounds = array<i64: 8, 128>}, {pipeline_mode = #tpu.pipeline_mode<synchronous>, transform_indices = @transform_1, window_bounds = array<i64: 128, 128>}, {pipeline_mode = #tpu.pipeline_mode<synchronous>, transform_indices = @transform_2, window_bounds = array<i64: 1, 128>}, {pipeline_mode = #tpu.pipeline_mode<synchronous>, transform_indices = @transform_3, window_bounds = array<i64: 128, 128>}, {pipeline_mode = #tpu.pipeline_mode<synchronous>, transform_indices = @transform_4, window_bounds = array<i64: 1, 128>}, {transform_indices = @transform_5, window_bounds = array<i64: 8, 128>}, {transform_indices = @transform_6, window_bounds = array<i64: 8, 128>}]} {
    %c0_i32 = arith.constant 0 : i32
    %0 = arith.cmpi eq, %arg1, %c0_i32 : i32
    %1 = arith.extui %0 : i1 to i32
    %c0_i32_0 = arith.constant 0 : i32
    %2 = arith.cmpi ne, %1, %c0_i32_0 : i32
    scf.if %2 {
      %cst_20 = arith.constant 0.000000e+00 : f32
      %25 = vector.broadcast %cst_20 : f32 to vector<8x128xf32>
      %c0_21 = arith.constant 0 : index
      %c0_22 = arith.constant 0 : index
      %26 = vector.load %arg9[%c0_21, %c0_22] : memref<8x128xf32, #tpu.memory_space<vmem>>, vector<8x128xf32>
      tpu.vector_store %arg9[%c0_21, %c0_22], %25 {strides = array<i32>} : memref<8x128xf32, #tpu.memory_space<vmem>>, vector<8x128xf32>,
    } else {
    }
    %c0 = arith.constant 0 : index
    %c0_1 = arith.constant 0 : index
    %3 = vector.load %arg2[%c0, %c0_1] : memref<8x128xf32, #tpu.memory_space<vmem>>, vector<8x128xf32>
    %c0_2 = arith.constant 0 : index
    %c0_3 = arith.constant 0 : index
    %4 = vector.load %arg3[%c0_2, %c0_3] : memref<128x128xf32, #tpu.memory_space<vmem>>, vector<128x128xf32>
    %cst = arith.constant dense<0.000000e+00> : vector<8x128xf32>
    %5 = tpu.matmul %3, %4, %cst {dimension_numbers = #tpu.dot_dimension_numbers<[1], [0], [0], [1], [0, 0, 1, 1], [], []>} : vector<8x128xf32>, vector<128x128xf32>, vector<8x128xf32> -> vector<8x128xf32>
    %c0_4 = arith.constant 0 : index
    %c0_5 = arith.constant 0 : index
    %6 = vector.load %arg4[%c0_4, %c0_5] : memref<1x128xf32, #tpu.memory_space<vmem>>, vector<1x128xf32>
    %7 = vector.broadcast %6 : vector<1x128xf32> to vector<8x128xf32>
    %8 = arith.addf %5, %7 : vector<8x128xf32>
    %cst_6 = arith.constant 5.000000e-01 : f32
    %9 = vector.broadcast %cst_6 : f32 to vector<8x128xf32>
    %10 = arith.mulf %9, %8 : vector<8x128xf32>
    %11 = math.tanh %10 : vector<8x128xf32>
    %cst_7 = arith.constant 1.000000e+00 : f32
    %12 = vector.broadcast %cst_7 : f32 to vector<8x128xf32>
    %13 = arith.addf %11, %12 : vector<8x128xf32>
    %cst_8 = arith.constant 5.000000e-01 : f32
    %14 = vector.broadcast %cst_8 : f32 to vector<8x128xf32>
    %15 = arith.mulf %14, %13 : vector<8x128xf32>
    %c0_9 = arith.constant 0 : index
    %c0_10 = arith.constant 0 : index
    %16 = vector.load %arg8[%c0_9, %c0_10] : memref<8x128xf32, #tpu.memory_space<vmem>>, vector<8x128xf32>
    tpu.vector_store %arg8[%c0_9, %c0_10], %15 {strides = array<i32>} : memref<8x128xf32, #tpu.memory_space<vmem>>, vector<8x128xf32>,
    %c0_11 = arith.constant 0 : index
    %c0_12 = arith.constant 0 : index
    %17 = vector.load %arg9[%c0_11, %c0_12] : memref<8x128xf32, #tpu.memory_space<vmem>>, vector<8x128xf32>
    %c0_13 = arith.constant 0 : index
    %c0_14 = arith.constant 0 : index
    %18 = vector.load %arg5[%c0_13, %c0_14] : memref<128x128xf32, #tpu.memory_space<vmem>>, vector<128x128xf32>
    %cst_15 = arith.constant dense<0.000000e+00> : vector<8x128xf32>
    %19 = tpu.matmul %15, %18, %cst_15 {dimension_numbers = #tpu.dot_dimension_numbers<[1], [0], [0], [1], [0, 0, 1, 1], [], []>} : vector<8x128xf32>, vector<128x128xf32>, vector<8x128xf32> -> vector<8x128xf32>
    %20 = arith.addf %17, %19 : vector<8x128xf32>
    %c0_16 = arith.constant 0 : index
    %c0_17 = arith.constant 0 : index
    %21 = vector.load %arg9[%c0_16, %c0_17] : memref<8x128xf32, #tpu.memory_space<vmem>>, vector<8x128xf32>
    tpu.vector_store %arg9[%c0_16, %c0_17], %20 {strides = array<i32>} : memref<8x128xf32, #tpu.memory_space<vmem>>, vector<8x128xf32>,
    %c0_i32_18 = arith.constant 0 : i32
    %22 = arith.cmpi eq, %arg1, %c0_i32_18 : i32
    %23 = arith.extui %22 : i1 to i32
    %c0_i32_19 = arith.constant 0 : i32
    %24 = arith.cmpi ne, %23, %c0_i32_19 : i32
    scf.if %24 {
      %c0_20 = arith.constant 0 : index
      %c0_21 = arith.constant 0 : index
      %25 = vector.load %arg9[%c0_20, %c0_21] : memref<8x128xf32, #tpu.memory_space<vmem>>, vector<8x128xf32>
      %c0_22 = arith.constant 0 : index
      %c0_23 = arith.constant 0 : index
      %26 = vector.load %arg6[%c0_22, %c0_23] : memref<1x128xf32, #tpu.memory_space<vmem>>, vector<1x128xf32>
      %27 = vector.broadcast %26 : vector<1x128xf32> to vector<8x128xf32>
      %28 = arith.addf %25, %27 : vector<8x128xf32>
      %c0_24 = arith.constant 0 : index
      %c0_25 = arith.constant 0 : index
      %29 = vector.load %arg7[%c0_24, %c0_25] : memref<8x128xf32, #tpu.memory_space<vmem>>, vector<8x128xf32>
      tpu.vector_store %arg7[%c0_24, %c0_25], %28 {strides = array<i32>} : memref<8x128xf32, #tpu.memory_space<vmem>>, vector<8x128xf32>,
    } else {
    }
    return
  }
  func.func @transform_0(%arg0: i32, %arg1: i32) -> (i32, i32) {
    %c0_i32 = arith.constant 0 : i32
    %c0_i32_0 = arith.constant 0 : i32
    return %arg0, %c0_i32 : i32, i32
  }
  func.func @transform_1(%arg0: i32, %arg1: i32) -> (i32, i32) {
    %c0_i32 = arith.constant 0 : i32
    %c0_i32_0 = arith.constant 0 : i32
    return %c0_i32, %arg1 : i32, i32
  }
  func.func @transform_2(%arg0: i32, %arg1: i32) -> (i32, i32) {
    %c0_i32 = arith.constant 0 : i32
    %c0_i32_0 = arith.constant 0 : i32
    return %c0_i32, %arg1 : i32, i32
  }
  func.func @transform_3(%arg0: i32, %arg1: i32) -> (i32, i32) {
    %c0_i32 = arith.constant 0 : i32
    %c0_i32_0 = arith.constant 0 : i32
    return %arg1, %c0_i32 : i32, i32
  }
  func.func @transform_4(%arg0: i32, %arg1: i32) -> (i32, i32) {
    %c0_i32 = arith.constant 0 : i32
    %c0_i32_0 = arith.constant 0 : i32
    %c0_i32_1 = arith.constant 0 : i32
    return %c0_i32, %c0_i32_0 : i32, i32
  }
  func.func @transform_5(%arg0: i32, %arg1: i32) -> (i32, i32) {
    %c0_i32 = arith.constant 0 : i32
    %c0_i32_0 = arith.constant 0 : i32
    return %arg0, %c0_i32 : i32, i32
  }
  func.func @transform_6(%arg0: i32, %arg1: i32) -> (i32, i32) {
    %c0_i32 = arith.constant 0 : i32
    return %arg0, %arg1 : i32, i32
  }
}

module attributes {stable_mosaic.version = 11 : i64} {
  func.func @_two_layer_kernel(%arg0: i32, %arg1: i32, %arg2: memref<8x128xf32, #tpu.memory_space<vmem>>, %arg3: memref<128x128xf32, #tpu.memory_space<vmem>>, %arg4: memref<1x128xf32, #tpu.memory_space<vmem>>, %arg5: memref<128x128xf32, #tpu.memory_space<vmem>>, %arg6: memref<1x128xf32, #tpu.memory_space<vmem>>, %arg7: memref<8x128xf32, #tpu.memory_space<vmem>>, %arg8: memref<8x128xf32, #tpu.memory_space<vmem>>, %arg9: memref<8x128xf32, #tpu.memory_space<vmem>>) attributes {dimension_semantics = [#tpu.dimension_semantics<parallel>, #tpu.dimension_semantics<arbitrary>], iteration_bounds = array<i64: 1, 1>, scalar_prefetch = 0 : i64, scratch_operands = 1 : i64, tpu.core_type = #tpu.core_type<tc>, window_params = [{transform_indices = @transform_0, window_bounds = array<i64: 8, 128>}, {transform_indices = @transform_1, window_bounds = array<i64: 128, 128>}, {transform_indices = @transform_2, window_bounds = array<i64: 1, 128>}, {transform_indices = @transform_3, window_bounds = array<i64: 128, 128>}, {pipeline_mode = #tpu.pipeline_mode<synchronous>, transform_indices = @transform_4, window_bounds = array<i64: 1, 128>}, {transform_indices = @transform_5, window_bounds = array<i64: 8, 128>}, {transform_indices = @transform_6, window_bounds = array<i64: 8, 128>}]} {
    %c0_i32 = arith.constant 0 : i32
    %0 = arith.cmpi eq, %arg1, %c0_i32 : i32
    %1 = arith.extui %0 : i1 to i32
    %c0_i32_0 = arith.constant 0 : i32
    %2 = arith.cmpi ne, %1, %c0_i32_0 : i32
    scf.if %2 {
      %cst_20 = arith.constant 0.000000e+00 : f32
      %25 = vector.broadcast %cst_20 : f32 to vector<8x128xf32>
      %c0_21 = arith.constant 0 : index
      %c0_22 = arith.constant 0 : index
      %26 = vector.load %arg9[%c0_21, %c0_22] : memref<8x128xf32, #tpu.memory_space<vmem>>, vector<8x128xf32>
      tpu.vector_store %arg9[%c0_21, %c0_22], %25 {strides = array<i32>} : memref<8x128xf32, #tpu.memory_space<vmem>>, vector<8x128xf32>,
    } else {
    }
    %c0 = arith.constant 0 : index
    %c0_1 = arith.constant 0 : index
    %3 = vector.load %arg2[%c0, %c0_1] : memref<8x128xf32, #tpu.memory_space<vmem>>, vector<8x128xf32>
    %c0_2 = arith.constant 0 : index
    %c0_3 = arith.constant 0 : index
    %4 = vector.load %arg3[%c0_2, %c0_3] : memref<128x128xf32, #tpu.memory_space<vmem>>, vector<128x128xf32>
    %cst = arith.constant dense<0.000000e+00> : vector<8x128xf32>
    %5 = tpu.matmul %3, %4, %cst {dimension_numbers = #tpu.dot_dimension_numbers<[1], [0], [0], [1], [0, 0, 1, 1], [], []>} : vector<8x128xf32>, vector<128x128xf32>, vector<8x128xf32> -> vector<8x128xf32>
    %c0_4 = arith.constant 0 : index
    %c0_5 = arith.constant 0 : index
    %6 = vector.load %arg4[%c0_4, %c0_5] : memref<1x128xf32, #tpu.memory_space<vmem>>, vector<1x128xf32>
    %7 = vector.broadcast %6 : vector<1x128xf32> to vector<8x128xf32>
    %8 = arith.addf %5, %7 : vector<8x128xf32>
    %cst_6 = arith.constant 5.000000e-01 : f32
    %9 = vector.broadcast %cst_6 : f32 to vector<8x128xf32>
    %10 = arith.mulf %9, %8 : vector<8x128xf32>
    %11 = math.tanh %10 : vector<8x128xf32>
    %cst_7 = arith.constant 1.000000e+00 : f32
    %12 = vector.broadcast %cst_7 : f32 to vector<8x128xf32>
    %13 = arith.addf %11, %12 : vector<8x128xf32>
    %cst_8 = arith.constant 5.000000e-01 : f32
    %14 = vector.broadcast %cst_8 : f32 to vector<8x128xf32>
    %15 = arith.mulf %14, %13 : vector<8x128xf32>
    %c0_9 = arith.constant 0 : index
    %c0_10 = arith.constant 0 : index
    %16 = vector.load %arg8[%c0_9, %c0_10] : memref<8x128xf32, #tpu.memory_space<vmem>>, vector<8x128xf32>
    tpu.vector_store %arg8[%c0_9, %c0_10], %15 {strides = array<i32>} : memref<8x128xf32, #tpu.memory_space<vmem>>, vector<8x128xf32>,
    %c0_11 = arith.constant 0 : index
    %c0_12 = arith.constant 0 : index
    %17 = vector.load %arg9[%c0_11, %c0_12] : memref<8x128xf32, #tpu.memory_space<vmem>>, vector<8x128xf32>
    %c0_13 = arith.constant 0 : index
    %c0_14 = arith.constant 0 : index
    %18 = vector.load %arg5[%c0_13, %c0_14] : memref<128x128xf32, #tpu.memory_space<vmem>>, vector<128x128xf32>
    %cst_15 = arith.constant dense<0.000000e+00> : vector<8x128xf32>
    %19 = tpu.matmul %15, %18, %cst_15 {dimension_numbers = #tpu.dot_dimension_numbers<[1], [0], [0], [1], [0, 0, 1, 1], [], []>} : vector<8x128xf32>, vector<128x128xf32>, vector<8x128xf32> -> vector<8x128xf32>
    %20 = arith.addf %17, %19 : vector<8x128xf32>
    %c0_16 = arith.constant 0 : index
    %c0_17 = arith.constant 0 : index
    %21 = vector.load %arg9[%c0_16, %c0_17] : memref<8x128xf32, #tpu.memory_space<vmem>>, vector<8x128xf32>
    tpu.vector_store %arg9[%c0_16, %c0_17], %20 {strides = array<i32>} : memref<8x128xf32, #tpu.memory_space<vmem>>, vector<8x128xf32>,
    %c0_i32_18 = arith.constant 0 : i32
    %22 = arith.cmpi eq, %arg1, %c0_i32_18 : i32
    %23 = arith.extui %22 : i1 to i32
    %c0_i32_19 = arith.constant 0 : i32
    %24 = arith.cmpi ne, %23, %c0_i32_19 : i32
    scf.if %24 {
      %c0_20 = arith.constant 0 : index
      %c0_21 = arith.constant 0 : index
      %25 = vector.load %arg9[%c0_20, %c0_21] : memref<8x128xf32, #tpu.memory_space<vmem>>, vector<8x128xf32>
      %c0_22 = arith.constant 0 : index
      %c0_23 = arith.constant 0 : index
      %26 = vector.load %arg6[%c0_22, %c0_23] : memref<1x128xf32, #tpu.memory_space<vmem>>, vector<1x128xf32>
      %27 = vector.broadcast %26 : vector<1x128xf32> to vector<8x128xf32>
      %28 = arith.addf %25, %27 : vector<8x128xf32>
      %c0_24 = arith.constant 0 : index
      %c0_25 = arith.constant 0 : index
      %29 = vector.load %arg7[%c0_24, %c0_25] : memref<8x128xf32, #tpu.memory_space<vmem>>, vector<8x128xf32>
      tpu.vector_store %arg7[%c0_24, %c0_25], %28 {strides = array<i32>} : memref<8x128xf32, #tpu.memory_space<vmem>>, vector<8x128xf32>,
    } else {
    }
    return
  }
  func.func @transform_0(%arg0: i32, %arg1: i32) -> (i32, i32) {
    %c0_i32 = arith.constant 0 : i32
    %c0_i32_0 = arith.constant 0 : i32
    return %arg0, %c0_i32 : i32, i32
  }
  func.func @transform_1(%arg0: i32, %arg1: i32) -> (i32, i32) {
    %c0_i32 = arith.constant 0 : i32
    %c0_i32_0 = arith.constant 0 : i32
    return %c0_i32, %arg1 : i32, i32
  }
  func.func @transform_2(%arg0: i32, %arg1: i32) -> (i32, i32) {
    %c0_i32 = arith.constant 0 : i32
    %c0_i32_0 = arith.constant 0 : i32
    return %c0_i32, %arg1 : i32, i32
  }
  func.func @transform_3(%arg0: i32, %arg1: i32) -> (i32, i32) {
    %c0_i32 = arith.constant 0 : i32
    %c0_i32_0 = arith.constant 0 : i32
    return %arg1, %c0_i32 : i32, i32
  }
  func.func @transform_4(%arg0: i32, %arg1: i32) -> (i32, i32) {
    %c0_i32 = arith.constant 0 : i32
    %c0_i32_0 = arith.constant 0 : i32
    %c0_i32_1 = arith.constant 0 : i32
    return %c0_i32, %c0_i32_0 : i32, i32
  }
  func.func @transform_5(%arg0: i32, %arg1: i32) -> (i32, i32) {
    %c0_i32 = arith.constant 0 : i32
    %c0_i32_0 = arith.constant 0 : i32
    return %arg0, %c0_i32 : i32, i32
  }
  func.func @transform_6(%arg0: i32, %arg1: i32) -> (i32, i32) {
    %c0_i32 = arith.constant 0 : i32
    return %arg0, %arg1 : i32, i32
  }
}

</mosaic_0001>

<bundles_post_ra>
// kernel: tpu_custom_call.1
= control target key start
LH: loop header
LB: loop body
LE: loop exit
PB: predicated region body
PF: predicated region fallthrough
CT: control target
= control target key end

     0   :  { %12 = vsyncpa [#allocation4], 0  ;;  %s716_s0 = inlined_call_operand.hbm [shape: f32[8,128], index: 0, kind: input, shape index: {}]   ;;  %s717_s1 = inlined_call_operand.hbm [shape: f32[128,128], index: 1, kind: input, shape index: {}]   ;;  %s718_s2 = inlined_call_operand.vmem [shape: f32[1,128], index: 2, kind: input, shape index: {}]   ;;  %s719_s3 = inlined_call_operand.hbm [shape: f32[128,128], index: 3, kind: input, shape index: {}]   ;;  %s720_s4 = inlined_call_operand.vmem [shape: f32[1,128], index: 4, kind: input, shape index: {}]   ;;  %s721_s5 = inlined_call_operand.hbm [shape: f32[8,128], index: 5, kind: output, shape index: {0}]   ;;  %s722_s6 = inlined_call_operand.hbm [shape: f32[8,128], index: 6, kind: output, shape index: {1}]  }
   0x1   :  { %13 = vsyncpa [#allocation7], 0 }
   0x2   :  { %14 = vsyncpa [#allocation5], 0 }
   0x3   :  { %15 = vsyncpa [#allocation11], 0  ;;  %s583_s21 = smov [#allocation6]   ;;  %s465_s25 = scalar_lea.hbm %s717_s1, 2048 }
   0x4   :  { %s31_s22 = sshll.u32 %s583_s21, 4  ;;  %p466_p0 = scmp.ne.s32.totalorder %s717_s1, %s465_s25  ;;  %s32_s22 = int_to_ptr.vmem [resolvable:$true] %s31_s22 }
   0x5   :  { %p469_p1 = scmp.lt.u32.totalorder %s465_s25, %s717_s1 }
   0x7   :  { %p471_p2 = pnand %p469_p1, %p466_p0 }
   0x9   :  { %474 = shalt.err (!%p471_p2)
}
   0xa   :  { %s475_s30 = scalar_lea.vmem %s32_s22, 2048  ;;  %p480_p4 = scmp.lt.s32.totalorder %s32_s22, %s32_s22 }
   0xb   :  { %p476_p3 = scmp.ne.s32.totalorder %s32_s22, %s475_s30  ;;  %p481_p5 = scmp.lt.s32.totalorder %s475_s30, %s475_s30 }
   0xd   :  { %p482_p6 = por %p481_p5, %p480_p4 }
   0xf   :  { %p483_p7 = pnand %p482_p6, %p476_p3 }
  0x11   :  { %486 = shalt.err (!%p483_p7)
}
  0x12   :  { %s584_s7 = smov 128   ;;  %s585_s8 = smov 8  }
  0x13   :  { %37 = dma.hbm_to_vmem [thread:$0]  %s717_s1, 2048, %s32_s22, [#allocation7], %s584_s7, %s584_s7, %s585_s8  }
  0x14   :  { %s586_s11 = smov [#allocation3]   ;;  %s587_s13 = smov [#allocation8]  }
  0x15   :  { %s22_s12 = sshll.u32 %s586_s11, 4  ;;  %s45_s14 = sshll.u32 %s587_s13, 4  ;;  %s23_s12 = int_to_ptr.vmem [resolvable:$true] %s22_s12  ;;  %s46_s14 = int_to_ptr.vmem [resolvable:$true] %s45_s14 }
  0x16   :  { %s487_s17 = scalar_lea.hbm %s716_s0, 128 }
  0x17   :  { %p488_p8 = scmp.ne.s32.totalorder %s716_s0, %s487_s17  ;;  %p491_p9 = scmp.lt.u32.totalorder %s487_s17, %s716_s0 }
  0x19   :  { %p493_p10 = pnand %p491_p9, %p488_p8 }
  0x1b   :  { %496 = shalt.err (!%p493_p10)
}
  0x1c   :  { %s497_s1 = scalar_lea.vmem %s23_s12, 128  ;;  %p502_p12 = scmp.lt.s32.totalorder %s23_s12, %s23_s12 }
  0x1d   :  { %p498_p11 = scmp.ne.s32.totalorder %s23_s12, %s497_s1  ;;  %p503_p13 = scmp.lt.s32.totalorder %s497_s1, %s497_s1 }
  0x1f   :  { %p504_p0 = por %p503_p13, %p502_p12 }
  0x21   :  { %p505_p1 = pnand %p504_p0, %p498_p11 }
  0x23   :  { %508 = shalt.err (!%p505_p1)
}
  0x24   :  { %25 = dma.hbm_to_vmem [thread:$0]  %s716_s0, 128, %s23_s12, [#allocation4]  }
  0x25   :  { %s509_s26 = scalar_lea.hbm %s719_s3, 2048 }
  0x26   :  { %p510_p2 = scmp.ne.s32.totalorder %s719_s3, %s509_s26  ;;  %p513_p3 = scmp.lt.u32.totalorder %s509_s26, %s719_s3 }
  0x28   :  { %p515_p4 = pnand %p513_p3, %p510_p2 }
  0x2a   :  { %518 = shalt.err (!%p515_p4)
}
  0x2b   :  { %s519_s9 = scalar_lea.vmem %s46_s14, 2048  ;;  %p524_p6 = scmp.lt.s32.totalorder %s46_s14, %s46_s14 }
  0x2c   :  { %p520_p5 = scmp.ne.s32.totalorder %s46_s14, %s519_s9  ;;  %p525_p7 = scmp.lt.s32.totalorder %s519_s9, %s519_s9 }
  0x2e   :  { %p526_p8 = por %p525_p7, %p524_p6 }
  0x30   :  { %p527_p9 = pnand %p526_p8, %p520_p5 }
  0x32   :  { %530 = shalt.err (!%p527_p9)
}
  0x33   :  { %51 = dma.hbm_to_vmem [thread:$0]  %s719_s3, 2048, %s46_s14, [#allocation7], %s584_s7, %s584_s7, %s585_s8  }
  0x34   :  { %575 = dma.done.wait [#allocation4], 128  }
  0x35   :  { %576 = vsyncadd [#allocation4], 4294967168 }
  0x36   :  { %577 = dma.done.wait [#allocation7], 4096  }
  0x37   :  { %578 = vsyncadd [#allocation7], 4294963200  ;;  %v588_v0 = vmov 0.0|0.0   ;;  %vm589_vm0 = vmmov 0   ;;  %v590_v1 = vmov 0.0   ;;  %v69_v2 = vld [vmem:[#allocation6] sm:$0xff] }
  0x38   :  { %405 = vmatprep.subr.bf16.mxu0 %v588_v0  ;;  %367 = vmatprep.mubr.msk.f32.mxu0 %vm589_vm0, %v590_v1  ;;  %v70_v3 = vld [vmem:[#allocation6 + $0x8] sm:$0xff]  ;;  %v71_v4 = vld [vmem:[#allocation6 + $0x10] sm:$0xff]  ;;  %v72_v6 = vld [vmem:[#allocation6 + $0x18] sm:$0xff]  ;;  %s591_s8 = smov [#allocation10]  }
  0x39   :  { %429 = vmatprep.subr.bf16.mxu1 %v588_v0  ;;  %402 = vmatprep.mubr.msk.f32.mxu1 %vm589_vm0, %v590_v1  ;;  %v406_v5 = vpack.c.bf16 %v70_v3, %v69_v2  ;;  %v409_v7 = vpack.c.bf16 %v72_v6, %v71_v4  ;;  %v73_v8 = vld [vmem:[#allocation6 + $0x20] sm:$0xff]  ;;  %v74_v9 = vld [vmem:[#allocation6 + $0x28] sm:$0xff]  ;;  %v170_v12 = vld [vmem:[#allocation8 + $0x10] sm:$0xff]  ;;  %s285_s11 = sshll.u32 %s591_s8, 4  ;;  %s286_s11 = int_to_ptr.vmem [resolvable:$true] %s285_s11 }
  0x3a   :  { %v168_v10 = vld [vmem:[#allocation8] sm:$0xff]  ;;  %v169_v11 = vld [vmem:[#allocation8 + $0x8] sm:$0xff]  ;;  %v171_v13 = vld [vmem:[#allocation8 + $0x18] sm:$0xff]  ;;  %v412_v14 = vpack.c.bf16 %v74_v9, %v73_v8  ;;  %s531_s12 = scalar_lea.vmem %s286_s11, 128  ;;  %p536_p11 = scmp.lt.s32.totalorder %s286_s11, %s286_s11 }
  0x3b   :  { %407 = vmatpush3.bf16.msra.mxu0 %v406_v5  ;;  %v430_v15 = vpack.c.bf16 %v169_v11, %v168_v10  ;;  %v75_v16 = vld [vmem:[#allocation6 + $0x30] sm:$0xff]  ;;  %v76_v17 = vld [vmem:[#allocation6 + $0x38] sm:$0xff]  ;;  %v433_v18 = vpack.c.bf16 %v171_v13, %v170_v12  ;;  %v172_v19 = vld [vmem:[#allocation8 + $0x20] sm:$0xff]  ;;  %p532_p10 = scmp.ne.s32.totalorder %s286_s11, %s531_s12  ;;  %p537_p12 = scmp.lt.s32.totalorder %s531_s12, %s531_s12 }
  0x3c   :  { %408 = vmatprep.subr.bf16.mxu0 %v588_v0  ;;  %v173_v20 = vld [vmem:[#allocation8 + $0x28] sm:$0xff]  ;;  %v415_v21 = vpack.c.bf16 %v76_v17, %v75_v16  ;;  %v77_v22 = vld [vmem:[#allocation6 + $0x40] sm:$0xff]  ;;  %v79_v26 = vld [vmem:[#allocation6 + $0x50] sm:$0xff] }
  0x3d   :  { %431 = vmatpush3.bf16.msra.mxu1 %v430_v15  ;;  %v78_v23 = vld [vmem:[#allocation6 + $0x48] sm:$0xff]  ;;  %v436_v24 = vpack.c.bf16 %v173_v20, %v172_v19  ;;  %v80_v27 = vld [vmem:[#allocation6 + $0x58] sm:$0xff]  ;;  %v81_v29 = vld [vmem:[#allocation6 + $0x60] sm:$0xff]  ;;  %p538_p13 = por %p537_p12, %p536_p11 }
  0x3e   :  { %432 = vmatprep.subr.bf16.mxu1 %v588_v0  ;;  %v418_v25 = vpack.c.bf16 %v78_v23, %v77_v22  ;;  %v421_v28 = vpack.c.bf16 %v80_v27, %v79_v26  ;;  %v82_v30 = vld [vmem:[#allocation6 + $0x68] sm:$0xff]  ;;  %v83_v32 = vld [vmem:[#allocation6 + $0x70] sm:$0xff]  ;;  %v84_v33 = vld [vmem:[#allocation6 + $0x78] sm:$0xff] }
  0x3f   :  { %410 = vmatpush3.bf16.msra.mxu0 %v409_v7  ;;  %v424_v31 = vpack.c.bf16 %v82_v30, %v81_v29  ;;  %v427_v34 = vpack.c.bf16 %v84_v33, %v83_v32  ;;  %v68_v35 = vld [vmem:[#allocation3] sm:$0xff]  ;;  %v174_v36 = vld [vmem:[#allocation8 + $0x30] sm:$0xff]  ;;  %v176_v39 = vld [vmem:[#allocation8 + $0x40] sm:$0xff]  ;;  %p539_p0 = pnand %p538_p13, %p532_p10 }
  0x40   :  { %411 = vmatprep.subr.bf16.mxu0 %v588_v0  ;;  %v175_v37 = vld [vmem:[#allocation8 + $0x38] sm:$0xff]  ;;  %v177_v40 = vld [vmem:[#allocation8 + $0x48] sm:$0xff]  ;;  %v178_v42 = vld [vmem:[#allocation8 + $0x50] sm:$0xff] }
  0x41   :  { %434 = vmatpush3.bf16.msra.mxu1 %v433_v18  ;;  %v439_v38 = vpack.c.bf16 %v175_v37, %v174_v36  ;;  %v442_v41 = vpack.c.bf16 %v177_v40, %v176_v39  ;;  %v179_v43 = vld [vmem:[#allocation8 + $0x58] sm:$0xff]  ;;  %v180_v45 = vld [vmem:[#allocation8 + $0x60] sm:$0xff]  ;;  %v181_v46 = vld [vmem:[#allocation8 + $0x68] sm:$0xff] }
  0x42   :  { %435 = vmatprep.subr.bf16.mxu1 %v588_v0  ;;  %v445_v44 = vpack.c.bf16 %v179_v43, %v178_v42  ;;  %v448_v47 = vpack.c.bf16 %v181_v46, %v180_v45  ;;  %v182_v48 = vld [vmem:[#allocation8 + $0x70] sm:$0xff]  ;;  %v183_v49 = vld [vmem:[#allocation8 + $0x78] sm:$0xff] }
  0x43   :  { %413 = vmatpush3.bf16.msra.mxu0 %v412_v14  ;;  %v451_v50 = vpack.c.bf16 %v183_v49, %v182_v48  ;;  %v299_v51 = vld [vmem:[%s718_s2] ss:$0 sm:$0xff] }
  0x44   :  { %414 = vmatprep.subr.bf16.mxu0 %v588_v0 }
  0x45   :  { %437 = vmatpush3.bf16.msra.mxu1 %v436_v24 }
  0x46   :  { %438 = vmatprep.subr.bf16.mxu1 %v588_v0 }
  0x47   :  { %416 = vmatpush3.bf16.msra.mxu0 %v415_v21 }
  0x48   :  { %417 = vmatprep.subr.bf16.mxu0 %v588_v0 }
  0x49   :  { %440 = vmatpush3.bf16.msra.mxu1 %v439_v38 }
  0x4a   :  { %441 = vmatprep.subr.bf16.mxu1 %v588_v0 }
  0x4b   :  { %419 = vmatpush3.bf16.msra.mxu0 %v418_v25 }
  0x4c   :  { %420 = vmatprep.subr.bf16.mxu0 %v588_v0 }
  0x4d   :  { %443 = vmatpush3.bf16.msra.mxu1 %v442_v41 }
  0x4e   :  { %444 = vmatprep.subr.bf16.mxu1 %v588_v0 }
  0x4f   :  { %422 = vmatpush3.bf16.msra.mxu0 %v421_v28 }
  0x50   :  { %423 = vmatprep.subr.bf16.mxu0 %v588_v0 }
  0x51   :  { %446 = vmatpush3.bf16.msra.mxu1 %v445_v44 }
  0x52   :  { %447 = vmatprep.subr.bf16.mxu1 %v588_v0 }
  0x53   :  { %425 = vmatpush3.bf16.msra.mxu0 %v424_v31 }
  0x54   :  { %426 = vmatprep.subr.bf16.mxu0 %v588_v0 }
  0x55   :  { %449 = vmatpush3.bf16.msra.mxu1 %v448_v47 }
  0x56   :  { %450 = vmatprep.subr.bf16.mxu1 %v588_v0 }
  0x57   :  { %428 = vmatpush3.bf16.msra.mxu0 %v427_v34 }
  0x59   :  { %452 = vmatpush3.bf16.msra.mxu1 %v451_v50 }
  0x5a   :  { %368 = vmatmul.mubr.f32.vlgmr.msra.gmra.mrb[0].mxu0 %v68_v35 }
 0x12d   :  { %v158_v52 = vpop.f32.mrb[0].mxu0 }
 0x12e   :  { %v159_v53 = vadd.f32 %v299_v51, %v158_v52  ;;  %v369_v54 = vpop.f32.mrb[1].mxu0 }
 0x130   :  { %v162_v55 = vmul.f32 0.5, %v159_v53 }
 0x132   :  { %463 = vtanh.f32 %v162_v55 }
 0x13c   :  { %v464_v56 = vpop.eup %463 }
 0x13d   :  { %v164_v57 = vadd.f32 1.0, %v464_v56 }
 0x13f   :  { %v165_v58 = vmul.f32 0.5, %v164_v57 }
 0x141   :  { %403 = vmatmul.mubr.f32.vlgmr.msra.gmra.mrb[0].mxu1 %v165_v58  ;;  %166 = vst [vmem:[#allocation10] sm:$0xff] %v165_v58 }
 0x142   :  { %542 = shalt.err (!%p539_p0)
}
 0x143   :  { %s543_s14 = scalar_lea.hbm %s722_s6, 128 }
 0x144   :  { %p544_p1 = scmp.ne.s32.totalorder %s722_s6, %s543_s14  ;;  %p547_p2 = scmp.lt.u32.totalorder %s543_s14, %s722_s6 }
 0x146   :  { %p549_p3 = pnand %p547_p2, %p544_p1 }
 0x148   :  { %552 = shalt.err (!%p549_p3)
}
 0x149   :  { %288 = dma.vmem_to_hbm [thread:$0]  %s286_s11, 128, %s722_s6, [#allocation11]   ;;  %v300_v59 = vld [vmem:[%s720_s4] ss:$0 sm:$0xff] }
 0x14a   :  { %s592_s22 = smov [#allocation9]  }
 0x14b   :  { %s275_s23 = sshll.u32 %s592_s22, 4  ;;  %s276_s23 = int_to_ptr.vmem [resolvable:$true] %s275_s23 }
 0x14c   :  { %s553_s24 = scalar_lea.vmem %s276_s23, 128  ;;  %p558_p5 = scmp.lt.s32.totalorder %s276_s23, %s276_s23 }
 0x14d   :  { %p554_p4 = scmp.ne.s32.totalorder %s276_s23, %s553_s24  ;;  %p559_p6 = scmp.lt.s32.totalorder %s553_s24, %s553_s24 }
 0x14f   :  { %p560_p7 = por %p559_p6, %p558_p5 }
 0x151   :  { %p561_p8 = pnand %p560_p7, %p554_p4 }
 0x214   :  { %v250_v60 = vpop.f32.mrb[0].mxu1 }
 0x215   :  { %v267_v61 = vadd.f32 %v300_v59, %v250_v60  ;;  %v404_v62 = vpop.f32.mrb[1].mxu1 }
 0x217   :  { %268 = vst [vmem:[#allocation9] sm:$0xff] %v267_v61 }
 0x218   :  { %564 = shalt.err (!%p561_p8)
}
 0x219   :  { %s565_s26 = scalar_lea.hbm %s721_s5, 128 }
 0x21a   :  { %p566_p9 = scmp.ne.s32.totalorder %s721_s5, %s565_s26  ;;  %p569_p10 = scmp.lt.u32.totalorder %s565_s26, %s721_s5 }
 0x21c   :  { %p571_p11 = pnand %p569_p10, %p566_p9 }
 0x21e   :  { %574 = shalt.err (!%p571_p11)
}
 0x21f   :  { %278 = dma.vmem_to_hbm [thread:$0]  %s276_s23, 128, %s721_s5, [#allocation5]  }
 0x220   :  { %579 = dma.done.wait [#allocation5], 128  }
 0x221   :  { %580 = vsyncadd [#allocation5], 4294967168 }
 0x222   :  { %581 = dma.done.wait [#allocation11], 128  }
 0x223   :  { %582 = vsyncadd [#allocation11], 4294967168 }
 0x224   :  { %295 = vsyncpa [#allocation4], 1 }
 0x225   :  { %296 = vsyncpa [#allocation7], 1 }
 0x226   :  { %297 = vsyncpa [#allocation5], 1 }
 0x227   :  { %298 = vsyncpa [#allocation11], 1 }

// kernel: tpu_custom_call.1
= control target key start
LH: loop header
LB: loop body
LE: loop exit
PB: predicated region body
PF: predicated region fallthrough
CT: control target
= control target key end

     0   :  { %12 = vsyncpa [#allocation4], 0  ;;  %s716_s0 = inlined_call_operand.hbm [shape: f32[8,128], index: 0, kind: input, shape index: {}]   ;;  %s717_s1 = inlined_call_operand.hbm [shape: f32[128,128], index: 1, kind: input, shape index: {}]   ;;  %s718_s2 = inlined_call_operand.vmem [shape: f32[1,128], index: 2, kind: input, shape index: {}]   ;;  %s719_s3 = inlined_call_operand.hbm [shape: f32[128,128], index: 3, kind: input, shape index: {}]   ;;  %s720_s4 = inlined_call_operand.vmem [shape: f32[1,128], index: 4, kind: input, shape index: {}]   ;;  %s721_s5 = inlined_call_operand.hbm [shape: f32[8,128], index: 5, kind: output, shape index: {0}]   ;;  %s722_s6 = inlined_call_operand.hbm [shape: f32[8,128], index: 6, kind: output, shape index: {1}]  }
   0x1   :  { %13 = vsyncpa [#allocation7], 0 }
   0x2   :  { %14 = vsyncpa [#allocation5], 0 }
   0x3   :  { %15 = vsyncpa [#allocation11], 0  ;;  %s583_s21 = smov [#allocation6]   ;;  %s465_s25 = scalar_lea.hbm %s717_s1, 2048 }
   0x4   :  { %s31_s22 = sshll.u32 %s583_s21, 4  ;;  %p466_p0 = scmp.ne.s32.totalorder %s717_s1, %s465_s25  ;;  %s32_s22 = int_to_ptr.vmem [resolvable:$true] %s31_s22 }
   0x5   :  { %p469_p1 = scmp.lt.u32.totalorder %s465_s25, %s717_s1 }
   0x7   :  { %p471_p2 = pnand %p469_p1, %p466_p0 }
   0x9   :  { %474 = shalt.err (!%p471_p2)
}
   0xa   :  { %s475_s30 = scalar_lea.vmem %s32_s22, 2048  ;;  %p480_p4 = scmp.lt.s32.totalorder %s32_s22, %s32_s22 }
   0xb   :  { %p476_p3 = scmp.ne.s32.totalorder %s32_s22, %s475_s30  ;;  %p481_p5 = scmp.lt.s32.totalorder %s475_s30, %s475_s30 }
   0xd   :  { %p482_p6 = por %p481_p5, %p480_p4 }
   0xf   :  { %p483_p7 = pnand %p482_p6, %p476_p3 }
  0x11   :  { %486 = shalt.err (!%p483_p7)
}
  0x12   :  { %s584_s7 = smov 128   ;;  %s585_s8 = smov 8  }
  0x13   :  { %37 = dma.hbm_to_vmem [thread:$0]  %s717_s1, 2048, %s32_s22, [#allocation7], %s584_s7, %s584_s7, %s585_s8  }
  0x14   :  { %s586_s11 = smov [#allocation3]   ;;  %s587_s13 = smov [#allocation8]  }
  0x15   :  { %s22_s12 = sshll.u32 %s586_s11, 4  ;;  %s45_s14 = sshll.u32 %s587_s13, 4  ;;  %s23_s12 = int_to_ptr.vmem [resolvable:$true] %s22_s12  ;;  %s46_s14 = int_to_ptr.vmem [resolvable:$true] %s45_s14 }
  0x16   :  { %s487_s17 = scalar_lea.hbm %s716_s0, 128 }
  0x17   :  { %p488_p8 = scmp.ne.s32.totalorder %s716_s0, %s487_s17  ;;  %p491_p9 = scmp.lt.u32.totalorder %s487_s17, %s716_s0 }
  0x19   :  { %p493_p10 = pnand %p491_p9, %p488_p8 }
  0x1b   :  { %496 = shalt.err (!%p493_p10)
}
  0x1c   :  { %s497_s1 = scalar_lea.vmem %s23_s12, 128  ;;  %p502_p12 = scmp.lt.s32.totalorder %s23_s12, %s23_s12 }
  0x1d   :  { %p498_p11 = scmp.ne.s32.totalorder %s23_s12, %s497_s1  ;;  %p503_p13 = scmp.lt.s32.totalorder %s497_s1, %s497_s1 }
  0x1f   :  { %p504_p0 = por %p503_p13, %p502_p12 }
  0x21   :  { %p505_p1 = pnand %p504_p0, %p498_p11 }
  0x23   :  { %508 = shalt.err (!%p505_p1)
}
  0x24   :  { %25 = dma.hbm_to_vmem [thread:$0]  %s716_s0, 128, %s23_s12, [#allocation4]  }
  0x25   :  { %s509_s26 = scalar_lea.hbm %s719_s3, 2048 }
  0x26   :  { %p510_p2 = scmp.ne.s32.totalorder %s719_s3, %s509_s26  ;;  %p513_p3 = scmp.lt.u32.totalorder %s509_s26, %s719_s3 }
  0x28   :  { %p515_p4 = pnand %p513_p3, %p510_p2 }
  0x2a   :  { %518 = shalt.err (!%p515_p4)
}
  0x2b   :  { %s519_s9 = scalar_lea.vmem %s46_s14, 2048  ;;  %p524_p6 = scmp.lt.s32.totalorder %s46_s14, %s46_s14 }
  0x2c   :  { %p520_p5 = scmp.ne.s32.totalorder %s46_s14, %s519_s9  ;;  %p525_p7 = scmp.lt.s32.totalorder %s519_s9, %s519_s9 }
  0x2e   :  { %p526_p8 = por %p525_p7, %p524_p6 }
  0x30   :  { %p527_p9 = pnand %p526_p8, %p520_p5 }
  0x32   :  { %530 = shalt.err (!%p527_p9)
}
  0x33   :  { %51 = dma.hbm_to_vmem [thread:$0]  %s719_s3, 2048, %s46_s14, [#allocation7], %s584_s7, %s584_s7, %s585_s8  }
  0x34   :  { %575 = dma.done.wait [#allocation4], 128  }
  0x35   :  { %576 = vsyncadd [#allocation4], 4294967168 }
  0x36   :  { %577 = dma.done.wait [#allocation7], 4096  }
  0x37   :  { %578 = vsyncadd [#allocation7], 4294963200  ;;  %v588_v0 = vmov 0.0|0.0   ;;  %vm589_vm0 = vmmov 0   ;;  %v590_v1 = vmov 0.0   ;;  %v69_v2 = vld [vmem:[#allocation6] sm:$0xff] }
  0x38   :  { %405 = vmatprep.subr.bf16.mxu0 %v588_v0  ;;  %367 = vmatprep.mubr.msk.f32.mxu0 %vm589_vm0, %v590_v1  ;;  %v70_v3 = vld [vmem:[#allocation6 + $0x8] sm:$0xff]  ;;  %v71_v4 = vld [vmem:[#allocation6 + $0x10] sm:$0xff]  ;;  %v72_v6 = vld [vmem:[#allocation6 + $0x18] sm:$0xff]  ;;  %s591_s8 = smov [#allocation10]  }
  0x39   :  { %429 = vmatprep.subr.bf16.mxu1 %v588_v0  ;;  %402 = vmatprep.mubr.msk.f32.mxu1 %vm589_vm0, %v590_v1  ;;  %v406_v5 = vpack.c.bf16 %v70_v3, %v69_v2  ;;  %v409_v7 = vpack.c.bf16 %v72_v6, %v71_v4  ;;  %v73_v8 = vld [vmem:[#allocation6 + $0x20] sm:$0xff]  ;;  %v74_v9 = vld [vmem:[#allocation6 + $0x28] sm:$0xff]  ;;  %v170_v12 = vld [vmem:[#allocation8 + $0x10] sm:$0xff]  ;;  %s285_s11 = sshll.u32 %s591_s8, 4  ;;  %s286_s11 = int_to_ptr.vmem [resolvable:$true] %s285_s11 }
  0x3a   :  { %v168_v10 = vld [vmem:[#allocation8] sm:$0xff]  ;;  %v169_v11 = vld [vmem:[#allocation8 + $0x8] sm:$0xff]  ;;  %v171_v13 = vld [vmem:[#allocation8 + $0x18] sm:$0xff]  ;;  %v412_v14 = vpack.c.bf16 %v74_v9, %v73_v8  ;;  %s531_s12 = scalar_lea.vmem %s286_s11, 128  ;;  %p536_p11 = scmp.lt.s32.totalorder %s286_s11, %s286_s11 }
  0x3b   :  { %407 = vmatpush3.bf16.msra.mxu0 %v406_v5  ;;  %v430_v15 = vpack.c.bf16 %v169_v11, %v168_v10  ;;  %v75_v16 = vld [vmem:[#allocation6 + $0x30] sm:$0xff]  ;;  %v76_v17 = vld [vmem:[#allocation6 + $0x38] sm:$0xff]  ;;  %v433_v18 = vpack.c.bf16 %v171_v13, %v170_v12  ;;  %v172_v19 = vld [vmem:[#allocation8 + $0x20] sm:$0xff]  ;;  %p532_p10 = scmp.ne.s32.totalorder %s286_s11, %s531_s12  ;;  %p537_p12 = scmp.lt.s32.totalorder %s531_s12, %s531_s12 }
  0x3c   :  { %408 = vmatprep.subr.bf16.mxu0 %v588_v0  ;;  %v173_v20 = vld [vmem:[#allocation8 + $0x28] sm:$0xff]  ;;  %v415_v21 = vpack.c.bf16 %v76_v17, %v75_v16  ;;  %v77_v22 = vld [vmem:[#allocation6 + $0x40] sm:$0xff]  ;;  %v79_v26 = vld [vmem:[#allocation6 + $0x50] sm:$0xff] }
  0x3d   :  { %431 = vmatpush3.bf16.msra.mxu1 %v430_v15  ;;  %v78_v23 = vld [vmem:[#allocation6 + $0x48] sm:$0xff]  ;;  %v436_v24 = vpack.c.bf16 %v173_v20, %v172_v19  ;;  %v80_v27 = vld [vmem:[#allocation6 + $0x58] sm:$0xff]  ;;  %v81_v29 = vld [vmem:[#allocation6 + $0x60] sm:$0xff]  ;;  %p538_p13 = por %p537_p12, %p536_p11 }
  0x3e   :  { %432 = vmatprep.subr.bf16.mxu1 %v588_v0  ;;  %v418_v25 = vpack.c.bf16 %v78_v23, %v77_v22  ;;  %v421_v28 = vpack.c.bf16 %v80_v27, %v79_v26  ;;  %v82_v30 = vld [vmem:[#allocation6 + $0x68] sm:$0xff]  ;;  %v83_v32 = vld [vmem:[#allocation6 + $0x70] sm:$0xff]  ;;  %v84_v33 = vld [vmem:[#allocation6 + $0x78] sm:$0xff] }
  0x3f   :  { %410 = vmatpush3.bf16.msra.mxu0 %v409_v7  ;;  %v424_v31 = vpack.c.bf16 %v82_v30, %v81_v29  ;;  %v427_v34 = vpack.c.bf16 %v84_v33, %v83_v32  ;;  %v68_v35 = vld [vmem:[#allocation3] sm:$0xff]  ;;  %v174_v36 = vld [vmem:[#allocation8 + $0x30] sm:$0xff]  ;;  %v176_v39 = vld [vmem:[#allocation8 + $0x40] sm:$0xff]  ;;  %p539_p0 = pnand %p538_p13, %p532_p10 }
  0x40   :  { %411 = vmatprep.subr.bf16.mxu0 %v588_v0  ;;  %v175_v37 = vld [vmem:[#allocation8 + $0x38] sm:$0xff]  ;;  %v177_v40 = vld [vmem:[#allocation8 + $0x48] sm:$0xff]  ;;  %v178_v42 = vld [vmem:[#allocation8 + $0x50] sm:$0xff] }
  0x41   :  { %434 = vmatpush3.bf16.msra.mxu1 %v433_v18  ;;  %v439_v38 = vpack.c.bf16 %v175_v37, %v174_v36  ;;  %v442_v41 = vpack.c.bf16 %v177_v40, %v176_v39  ;;  %v179_v43 = vld [vmem:[#allocation8 + $0x58] sm:$0xff]  ;;  %v180_v45 = vld [vmem:[#allocation8 + $0x60] sm:$0xff]  ;;  %v181_v46 = vld [vmem:[#allocation8 + $0x68] sm:$0xff] }
  0x42   :  { %435 = vmatprep.subr.bf16.mxu1 %v588_v0  ;;  %v445_v44 = vpack.c.bf16 %v179_v43, %v178_v42  ;;  %v448_v47 = vpack.c.bf16 %v181_v46, %v180_v45  ;;  %v182_v48 = vld [vmem:[#allocation8 + $0x70] sm:$0xff]  ;;  %v183_v49 = vld [vmem:[#allocation8 + $0x78] sm:$0xff] }
  0x43   :  { %413 = vmatpush3.bf16.msra.mxu0 %v412_v14  ;;  %v451_v50 = vpack.c.bf16 %v183_v49, %v182_v48  ;;  %v299_v51 = vld [vmem:[%s718_s2] ss:$0 sm:$0xff] }
  0x44   :  { %414 = vmatprep.subr.bf16.mxu0 %v588_v0 }
  0x45   :  { %437 = vmatpush3.bf16.msra.mxu1 %v436_v24 }
  0x46   :  { %438 = vmatprep.subr.bf16.mxu1 %v588_v0 }
  0x47   :  { %416 = vmatpush3.bf16.msra.mxu0 %v415_v21 }
  0x48   :  { %417 = vmatprep.subr.bf16.mxu0 %v588_v0 }
  0x49   :  { %440 = vmatpush3.bf16.msra.mxu1 %v439_v38 }
  0x4a   :  { %441 = vmatprep.subr.bf16.mxu1 %v588_v0 }
  0x4b   :  { %419 = vmatpush3.bf16.msra.mxu0 %v418_v25 }
  0x4c   :  { %420 = vmatprep.subr.bf16.mxu0 %v588_v0 }
  0x4d   :  { %443 = vmatpush3.bf16.msra.mxu1 %v442_v41 }
  0x4e   :  { %444 = vmatprep.subr.bf16.mxu1 %v588_v0 }
  0x4f   :  { %422 = vmatpush3.bf16.msra.mxu0 %v421_v28 }
  0x50   :  { %423 = vmatprep.subr.bf16.mxu0 %v588_v0 }
  0x51   :  { %446 = vmatpush3.bf16.msra.mxu1 %v445_v44 }
  0x52   :  { %447 = vmatprep.subr.bf16.mxu1 %v588_v0 }
  0x53   :  { %425 = vmatpush3.bf16.msra.mxu0 %v424_v31 }
  0x54   :  { %426 = vmatprep.subr.bf16.mxu0 %v588_v0 }
  0x55   :  { %449 = vmatpush3.bf16.msra.mxu1 %v448_v47 }
  0x56   :  { %450 = vmatprep.subr.bf16.mxu1 %v588_v0 }
  0x57   :  { %428 = vmatpush3.bf16.msra.mxu0 %v427_v34 }
  0x59   :  { %452 = vmatpush3.bf16.msra.mxu1 %v451_v50 }
  0x5a   :  { %368 = vmatmul.mubr.f32.vlgmr.msra.gmra.mrb[0].mxu0 %v68_v35 }
 0x12d   :  { %v158_v52 = vpop.f32.mrb[0].mxu0 }
 0x12e   :  { %v159_v53 = vadd.f32 %v299_v51, %v158_v52  ;;  %v369_v54 = vpop.f32.mrb[1].mxu0 }
 0x130   :  { %v162_v55 = vmul.f32 0.5, %v159_v53 }
 0x132   :  { %463 = vtanh.f32 %v162_v55 }
 0x13c   :  { %v464_v56 = vpop.eup %463 }
 0x13d   :  { %v164_v57 = vadd.f32 1.0, %v464_v56 }
 0x13f   :  { %v165_v58 = vmul.f32 0.5, %v164_v57 }
 0x141   :  { %403 = vmatmul.mubr.f32.vlgmr.msra.gmra.mrb[0].mxu1 %v165_v58  ;;  %166 = vst [vmem:[#allocation10] sm:$0xff] %v165_v58 }
 0x142   :  { %542 = shalt.err (!%p539_p0)
}
 0x143   :  { %s543_s14 = scalar_lea.hbm %s722_s6, 128 }
 0x144   :  { %p544_p1 = scmp.ne.s32.totalorder %s722_s6, %s543_s14  ;;  %p547_p2 = scmp.lt.u32.totalorder %s543_s14, %s722_s6 }
 0x146   :  { %p549_p3 = pnand %p547_p2, %p544_p1 }
 0x148   :  { %552 = shalt.err (!%p549_p3)
}
 0x149   :  { %288 = dma.vmem_to_hbm [thread:$0]  %s286_s11, 128, %s722_s6, [#allocation11]   ;;  %v300_v59 = vld [vmem:[%s720_s4] ss:$0 sm:$0xff] }
 0x14a   :  { %s592_s22 = smov [#allocation9]  }
 0x14b   :  { %s275_s23 = sshll.u32 %s592_s22, 4  ;;  %s276_s23 = int_to_ptr.vmem [resolvable:$true] %s275_s23 }
 0x14c   :  { %s553_s24 = scalar_lea.vmem %s276_s23, 128  ;;  %p558_p5 = scmp.lt.s32.totalorder %s276_s23, %s276_s23 }
 0x14d   :  { %p554_p4 = scmp.ne.s32.totalorder %s276_s23, %s553_s24  ;;  %p559_p6 = scmp.lt.s32.totalorder %s553_s24, %s553_s24 }
 0x14f   :  { %p560_p7 = por %p559_p6, %p558_p5 }
 0x151   :  { %p561_p8 = pnand %p560_p7, %p554_p4 }
 0x214   :  { %v250_v60 = vpop.f32.mrb[0].mxu1 }
 0x215   :  { %v267_v61 = vadd.f32 %v300_v59, %v250_v60  ;;  %v404_v62 = vpop.f32.mrb[1].mxu1 }
 0x217   :  { %268 = vst [vmem:[#allocation9] sm:$0xff] %v267_v61 }
 0x218   :  { %564 = shalt.err (!%p561_p8)
}
 0x219   :  { %s565_s26 = scalar_lea.hbm %s721_s5, 128 }
 0x21a   :  { %p566_p9 = scmp.ne.s32.totalorder %s721_s5, %s565_s26  ;;  %p569_p10 = scmp.lt.u32.totalorder %s565_s26, %s721_s5 }
 0x21c   :  { %p571_p11 = pnand %p569_p10, %p566_p9 }
 0x21e   :  { %574 = shalt.err (!%p571_p11)
}
 0x21f   :  { %278 = dma.vmem_to_hbm [thread:$0]  %s276_s23, 128, %s721_s5, [#allocation5]  }
 0x220   :  { %579 = dma.done.wait [#allocation5], 128  }
 0x221   :  { %580 = vsyncadd [#allocation5], 4294967168 }
 0x222   :  { %581 = dma.done.wait [#allocation11], 128  }
 0x223   :  { %582 = vsyncadd [#allocation11], 4294967168 }
 0x224   :  { %295 = vsyncpa [#allocation4], 1 }
 0x225   :  { %296 = vsyncpa [#allocation7], 1 }
 0x226   :  { %297 = vsyncpa [#allocation5], 1 }
 0x227   :  { %298 = vsyncpa [#allocation11], 1 }

</bundles_post_ra>
